<compile_context>
chip_gen: v7x
topology: tpu7x:2x2x1
jax: 0.10.0
libtpu: 0.0.40
codegen_flags: <defaults>
</compile_context>

<pallas_src>
import functools

import jax
import jax.numpy as jnp
from jax import lax
from jax.experimental import pallas as pl
from jax.experimental.pallas import tpu as pltpu


# ----------------------------- Pallas kernel ---------------------------------

def _convlstm_kernel(xcol_ref, wih_ref, h1_ref, whh_ref, cx_ref,
                     hy_ref, cy_ref, *, ch):
    """Single invocation; batch is folded into the lane axis.

    xcol_ref : (K_ih, N*P)   bf16   im2col(x), K zero-padded to 48
    wih_ref  : (4*Ch, K_ih)  bf16   conv_ih weight (OIHW flattened, zero-padded)
    h1_ref   : (K_hh, N*P)   bf16   [hx ; ones ; zero-pad] rows, K_hh = 16
    whh_ref  : (4*Ch, K_hh)  bf16   [conv_hh 1x1 ; (b_ih+b_hh) ; zero-pad] cols
    cx_ref   : (Ch, N*P)     f32    previous cell state
    hy_ref   : (Ch, N*P)     f32    new hidden state
    cy_ref   : (Ch, N*P)     f32    new cell state
    """
    # Two MXU pushes, accumulated in f32 (bias rides in via the ones-row column).
    gates = jnp.dot(wih_ref[...], xcol_ref[...],
                    preferred_element_type=jnp.float32)
    gates = gates + jnp.dot(whh_ref[...], h1_ref[...],
                            preferred_element_type=jnp.float32)

    # PyTorch chunk order along the channel axis: i, f, g, o.
    # 8-row slices are sublane-aligned.
    ingate     = jax.nn.sigmoid(gates[0 * ch:1 * ch, :])
    forgetgate = jax.nn.sigmoid(gates[1 * ch:2 * ch, :])
    cellgate   = jnp.tanh(gates[2 * ch:3 * ch, :])
    outgate    = jax.nn.sigmoid(gates[3 * ch:4 * ch, :])

    cy = forgetgate * cx_ref[...] + ingate * cellgate
    hy_ref[...] = outgate * jnp.tanh(cy)
    cy_ref[...] = cy


# ------------------------------- wrapper --------------------------------------

@jax.jit
def conv_lstm_cell(x, hx, cx, w_ih, b_ih, w_hh, b_hh):
    """ConvLSTMCell.forward.

    x      : (N, Cin, Hin, Win)     NCHW
    hx/cx  : (N, Ch, Ho, Wo)        Ho = Hin - KH + 1, Wo = Win - KW + 1
    w_ih   : (4*Ch, Cin, KH, KW)    OIHW
    w_hh   : (4*Ch, Ch, 1, 1)
    b_ih, b_hh : (4*Ch,)
    returns (hy, cy) each (N, Ch, Ho, Wo).
    """
    n, cin, hin, win = x.shape
    four_ch, _, kh_sz, kw_sz = w_ih.shape
    ch = four_ch // 4
    ho, wo = hin - kh_sz + 1, win - kw_sz + 1
    p = ho * wo
    npix = n * p

    k_conv = cin * kh_sz * kw_sz                      # 36
    k_ih = ((k_conv + 15) // 16) * 16                 # 48  (bf16 sublane pack)
    k_hh = ((ch + 1 + 15) // 16) * 16                 # 16

    # --- im2col in bf16, channels-first:
    #     x_col[n, c*KH*KW + kh*KW + kw, oh*Wo + ow] = x[n, c, oh+kh, ow+kw]
    xb = x.astype(jnp.bfloat16)
    patches = []
    for kh in range(kh_sz):
        for kw in range(kw_sz):
            patches.append(xb[:, :, kh:kh + ho, kw:kw + wo])
    x_col = jnp.stack(patches, axis=2).reshape(n, k_conv, p)   # (N, 36, P)

    # fold batch into the lane axis: (K, N*P); zero-pad K 36 -> 48.
    x_slab = jnp.transpose(x_col, (1, 0, 2)).reshape(k_conv, npix)
    x_slab = jnp.pad(x_slab, ((0, k_ih - k_conv), (0, 0)))

    # hidden slab: (Ch, N*P) ++ ones row (carries the bias) ++ zero pad to 16 rows.
    hx_slab = jnp.transpose(hx.reshape(n, ch, p), (1, 0, 2)).reshape(ch, npix)
    h_slab = jnp.concatenate(
        [hx_slab.astype(jnp.bfloat16),
         jnp.ones((1, npix), jnp.bfloat16),
         jnp.zeros((k_hh - ch - 1, npix), jnp.bfloat16)], axis=0)

    cx_slab = jnp.transpose(cx.reshape(n, ch, p), (1, 0, 2)).reshape(ch, npix)

    # weights: conv_ih flattened OIHW (zero-padded), conv_hh 1x1 with the
    # combined bias as an extra column matched to the ones row, zero-padded.
    w_ih_flat = jnp.pad(w_ih.reshape(four_ch, k_conv),
                        ((0, 0), (0, k_ih - k_conv))).astype(jnp.bfloat16)
    w_hh_flat = jnp.concatenate(
        [w_hh.reshape(four_ch, ch),
         (b_ih + b_hh).reshape(four_ch, 1),
         jnp.zeros((four_ch, k_hh - ch - 1), w_hh.dtype)],
        axis=1).astype(jnp.bfloat16)

    kernel = functools.partial(_convlstm_kernel, ch=ch)

    hy, cy = pl.pallas_call(
        kernel,
        out_shape=(jax.ShapeDtypeStruct((ch, npix), jnp.float32),
                   jax.ShapeDtypeStruct((ch, npix), jnp.float32)),
        grid=(1,),                                   # single step: batch is in lanes
        in_specs=[
            pl.BlockSpec((k_ih, npix), lambda i: (0, 0)),
            pl.BlockSpec((four_ch, k_ih), lambda i: (0, 0)),
            pl.BlockSpec((k_hh, npix), lambda i: (0, 0)),
            pl.BlockSpec((four_ch, k_hh), lambda i: (0, 0)),
            pl.BlockSpec((ch, npix), lambda i: (0, 0)),
        ],
        out_specs=(
            pl.BlockSpec((ch, npix), lambda i: (0, 0)),
            pl.BlockSpec((ch, npix), lambda i: (0, 0)),
        ),
        compiler_params=pltpu.CompilerParams(
            dimension_semantics=("arbitrary",)),
    )(x_slab, w_ih_flat, h_slab, w_hh_flat, cx_slab)

    # back to NCHW (tiny transposes; fused by the surrounding jit).
    hy = jnp.transpose(hy.reshape(ch, n, ho, wo), (1, 0, 2, 3))
    cy = jnp.transpose(cy.reshape(ch, n, ho, wo), (1, 0, 2, 3))
    return hy, cy


# --------------------------- pure-JAX reference --------------------------------

def conv_lstm_cell_ref(x, hx, cx, w_ih, b_ih, w_hh, b_hh):
    dn = ('NCHW', 'OIHW', 'NCHW')
    gates = lax.conv_general_dilated(x, w_ih, (1, 1), 'VALID',
                                     dimension_numbers=dn)
    gates = gates + b_ih[None, :, None, None]
    gates = gates + lax.conv_general_dilated(hx, w_hh, (1, 1), 'VALID',
                                             dimension_numbers=dn)
    gates = gates + b_hh[None, :, None, None]
    i, f, g, o = jnp.split(gates, 4, axis=1)
    i, f, o = jax.nn.sigmoid(i), jax.nn.sigmoid(f), jax.nn.sigmoid(o)
    g = jnp.tanh(g)
    cy = f * cx + i * g
    hy = o * jnp.tanh(cy)
    return hy, cy


# --------------------------------- main ----------------------------------------

if __name__ == "__main__":
    # module config (PyTorch defaults): ConvLSTMCell(input_channels=4,
    # hidden_channels=8, kernel_size=3, padding=0, hidden_kernel_size=1)
    N, CIN, CH = 2, 4, 8
    KH = KW = 3
    HIN = WIN = 18
    HO, WO = HIN - KH + 1, WIN - KW + 1          # 16 x 16 (VALID conv) -> P = 256

    key = jax.random.PRNGKey(0)
    k = list(jax.random.split(key, 8))

    x  = jax.random.normal(k[0], (N, CIN, HIN, WIN), jnp.float32)
    hx = jax.random.normal(k[1], (N, CH, HO, WO), jnp.float32)
    cx = jax.random.normal(k[2], (N, CH, HO, WO), jnp.float32)

    # deterministic parameter init (uniform(-1/sqrt(fan_in), +1/sqrt(fan_in)),
    # matching nn.Conv2d.reset_parameters' bound); shapes as in __init__.
    fan_ih = CIN * KH * KW
    fan_hh = CH * 1 * 1
    b1 = 1.0 / jnp.sqrt(fan_ih)
    b2 = 1.0 / jnp.sqrt(fan_hh)
    w_ih = jax.random.uniform(k[3], (4 * CH, CIN, KH, KW), jnp.float32, -b1, b1)
    b_ih = jax.random.uniform(k[4], (4 * CH,), jnp.float32, -b1, b1)
    w_hh = jax.random.uniform(k[5], (4 * CH, CH, 1, 1), jnp.float32, -b2, b2)
    b_hh = jax.random.uniform(k[6], (4 * CH,), jnp.float32, -b2, b2)

    hy, cy = conv_lstm_cell(x, hx, cx, w_ih, b_ih, w_hh, b_hh)
    jax.block_until_ready((hy, cy))

    hy_r, cy_r = conv_lstm_cell_ref(x, hx, cx, w_ih, b_ih, w_hh, b_hh)
    assert hy.shape == (N, CH, HO, WO) and cy.shape == (N, CH, HO, WO)
    # tolerance sized for the bf16 MXU operands (f32 accumulation + f32 gating)
    assert jnp.allclose(hy, hy_r, rtol=2e-2, atol=2e-2)
    assert jnp.allclose(cy, cy_r, rtol=2e-2, atol=2e-2)

    print("KERNEL_OK")
</pallas_src>

<mosaic_0001>
module attributes {stable_mosaic.version = 11 : i64} {
  func.func @_convlstm_kernel(%arg0: i32, %arg1: memref<48x512xbf16, #tpu.memory_space<vmem>>, %arg2: memref<32x48xbf16, #tpu.memory_space<vmem>>, %arg3: memref<16x512xbf16, #tpu.memory_space<vmem>>, %arg4: memref<32x16xbf16, #tpu.memory_space<vmem>>, %arg5: memref<8x512xf32, #tpu.memory_space<vmem>>, %arg6: memref<8x512xf32, #tpu.memory_space<vmem>>, %arg7: memref<8x512xf32, #tpu.memory_space<vmem>>) attributes {dimension_semantics = [#tpu.dimension_semantics<arbitrary>], iteration_bounds = array<i64: 1>, scalar_prefetch = 0 : i64, scratch_operands = 0 : i64, tpu.core_type = #tpu.core_type<tc>, window_params = [{pipeline_mode = #tpu.pipeline_mode<synchronous>, transform_indices = @transform_0, window_bounds = array<i64: 48, 512>}, {pipeline_mode = #tpu.pipeline_mode<synchronous>, transform_indices = @transform_1, window_bounds = array<i64: 32, 48>}, {pipeline_mode = #tpu.pipeline_mode<synchronous>, transform_indices = @transform_2, window_bounds = array<i64: 16, 512>}, {pipeline_mode = #tpu.pipeline_mode<synchronous>, transform_indices = @transform_3, window_bounds = array<i64: 32, 16>}, {pipeline_mode = #tpu.pipeline_mode<synchronous>, transform_indices = @transform_4, window_bounds = array<i64: 8, 512>}, {pipeline_mode = #tpu.pipeline_mode<synchronous>, transform_indices = @transform_5, window_bounds = array<i64: 8, 512>}, {pipeline_mode = #tpu.pipeline_mode<synchronous>, transform_indices = @transform_6, window_bounds = array<i64: 8, 512>}]} {
    %c0 = arith.constant 0 : index
    %c0_0 = arith.constant 0 : index
    %0 = vector.load %arg2[%c0, %c0_0] : memref<32x48xbf16, #tpu.memory_space<vmem>>, vector<32x48xbf16>
    %c0_1 = arith.constant 0 : index
    %c0_2 = arith.constant 0 : index
    %1 = vector.load %arg1[%c0_1, %c0_2] : memref<48x512xbf16, #tpu.memory_space<vmem>>, vector<48x512xbf16>
    %cst = arith.constant dense<0.000000e+00> : vector<32x512xf32>
    %2 = tpu.matmul %0, %1, %cst {dimension_numbers = #tpu.dot_dimension_numbers<[1], [0], [0], [1], [0, 0, 1, 1], [], []>} : vector<32x48xbf16>, vector<48x512xbf16>, vector<32x512xf32> -> vector<32x512xf32>
    %c0_3 = arith.constant 0 : index
    %c0_4 = arith.constant 0 : index
    %3 = vector.load %arg4[%c0_3, %c0_4] : memref<32x16xbf16, #tpu.memory_space<vmem>>, vector<32x16xbf16>
    %c0_5 = arith.constant 0 : index
    %c0_6 = arith.constant 0 : index
    %4 = vector.load %arg3[%c0_5, %c0_6] : memref<16x512xbf16, #tpu.memory_space<vmem>>, vector<16x512xbf16>
    %cst_7 = arith.constant dense<0.000000e+00> : vector<32x512xf32>
    %5 = tpu.matmul %3, %4, %cst_7 {dimension_numbers = #tpu.dot_dimension_numbers<[1], [0], [0], [1], [0, 0, 1, 1], [], []>} : vector<32x16xbf16>, vector<16x512xbf16>, vector<32x512xf32> -> vector<32x512xf32>
    %6 = arith.addf %2, %5 : vector<32x512xf32>
    %7 = vector.extract_strided_slice %6 {offsets = [0, 0], sizes = [8, 512], strides = [1, 1]} : vector<32x512xf32> to vector<8x512xf32>
    %8 = arith.negf %7 : vector<8x512xf32>
    %9 = math.exp %8 : vector<8x512xf32>
    %cst_8 = arith.constant 1.000000e+00 : f32
    %10 = vector.broadcast %cst_8 : f32 to vector<8x512xf32>
    %11 = arith.addf %10, %9 : vector<8x512xf32>
    %12 = arith.divf %10, %11 : vector<8x512xf32>
    %13 = vector.extract_strided_slice %6 {offsets = [8, 0], sizes = [8, 512], strides = [1, 1]} : vector<32x512xf32> to vector<8x512xf32>
    %14 = arith.negf %13 : vector<8x512xf32>
    %15 = math.exp %14 : vector<8x512xf32>
    %cst_9 = arith.constant 1.000000e+00 : f32
    %16 = vector.broadcast %cst_9 : f32 to vector<8x512xf32>
    %17 = arith.addf %16, %15 : vector<8x512xf32>
    %18 = arith.divf %16, %17 : vector<8x512xf32>
    %19 = vector.extract_strided_slice %6 {offsets = [16, 0], sizes = [8, 512], strides = [1, 1]} : vector<32x512xf32> to vector<8x512xf32>
    %20 = math.tanh %19 : vector<8x512xf32>
    %21 = vector.extract_strided_slice %6 {offsets = [24, 0], sizes = [8, 512], strides = [1, 1]} : vector<32x512xf32> to vector<8x512xf32>
    %22 = arith.negf %21 : vector<8x512xf32>
    %23 = math.exp %22 : vector<8x512xf32>
    %cst_10 = arith.constant 1.000000e+00 : f32
    %24 = vector.broadcast %cst_10 : f32 to vector<8x512xf32>
    %25 = arith.addf %24, %23 : vector<8x512xf32>
    %26 = arith.divf %24, %25 : vector<8x512xf32>
    %c0_11 = arith.constant 0 : index
    %c0_12 = arith.constant 0 : index
    %27 = vector.load %arg5[%c0_11, %c0_12] : memref<8x512xf32, #tpu.memory_space<vmem>>, vector<8x512xf32>
    %28 = arith.mulf %18, %27 : vector<8x512xf32>
    %29 = arith.mulf %12, %20 : vector<8x512xf32>
    %30 = arith.addf %28, %29 : vector<8x512xf32>
    %31 = math.tanh %30 : vector<8x512xf32>
    %32 = arith.mulf %26, %31 : vector<8x512xf32>
    %c0_13 = arith.constant 0 : index
    %c0_14 = arith.constant 0 : index
    %33 = vector.load %arg6[%c0_13, %c0_14] : memref<8x512xf32, #tpu.memory_space<vmem>>, vector<8x512xf32>
    tpu.vector_store %arg6[%c0_13, %c0_14], %32 {strides = array<i32>} : memref<8x512xf32, #tpu.memory_space<vmem>>, vector<8x512xf32>,
    %c0_15 = arith.constant 0 : index
    %c0_16 = arith.constant 0 : index
    %34 = vector.load %arg7[%c0_15, %c0_16] : memref<8x512xf32, #tpu.memory_space<vmem>>, vector<8x512xf32>
    tpu.vector_store %arg7[%c0_15, %c0_16], %30 {strides = array<i32>} : memref<8x512xf32, #tpu.memory_space<vmem>>, vector<8x512xf32>,
    return
  }
  func.func @transform_0(%arg0: i32) -> (i32, i32) {
    %c0_i32 = arith.constant 0 : i32
    %c0_i32_0 = arith.constant 0 : i32
    %c0_i32_1 = arith.constant 0 : i32
    return %c0_i32, %c0_i32_0 : i32, i32
  }
  func.func @transform_1(%arg0: i32) -> (i32, i32) {
    %c0_i32 = arith.constant 0 : i32
    %c0_i32_0 = arith.constant 0 : i32
    %c0_i32_1 = arith.constant 0 : i32
    return %c0_i32, %c0_i32_0 : i32, i32
  }
  func.func @transform_2(%arg0: i32) -> (i32, i32) {
    %c0_i32 = arith.constant 0 : i32
    %c0_i32_0 = arith.constant 0 : i32
    %c0_i32_1 = arith.constant 0 : i32
    return %c0_i32, %c0_i32_0 : i32, i32
  }
  func.func @transform_3(%arg0: i32) -> (i32, i32) {
    %c0_i32 = arith.constant 0 : i32
    %c0_i32_0 = arith.constant 0 : i32
    %c0_i32_1 = arith.constant 0 : i32
    return %c0_i32, %c0_i32_0 : i32, i32
  }
  func.func @transform_4(%arg0: i32) -> (i32, i32) {
    %c0_i32 = arith.constant 0 : i32
    %c0_i32_0 = arith.constant 0 : i32
    %c0_i32_1 = arith.constant 0 : i32
    return %c0_i32, %c0_i32_0 : i32, i32
  }
  func.func @transform_5(%arg0: i32) -> (i32, i32) {
    %c0_i32 = arith.constant 0 : i32
    %c0_i32_0 = arith.constant 0 : i32
    %c0_i32_1 = arith.constant 0 : i32
    return %c0_i32, %c0_i32_0 : i32, i32
  }
  func.func @transform_6(%arg0: i32) -> (i32, i32) {
    %c0_i32 = arith.constant 0 : i32
    %c0_i32_0 = arith.constant 0 : i32
    %c0_i32_1 = arith.constant 0 : i32
    return %c0_i32, %c0_i32_0 : i32, i32
  }
}

</mosaic_0001>

<bundles_post_ra>
// kernel: conv_lstm_cell.1
= control target key start
LH: loop header
LB: loop body
LE: loop exit
PB: predicated region body
PF: predicated region fallthrough
CT: control target
= control target key end

     0   :  { %v638_v1 = vmov 0   ;;  %vm77_vm0 = vcmask 130048   ;;  %vm260_vm1 = vcmask 392192   ;;  %s774_s2 = inlined_call_operand.vmem [shape: bf16[16,512], index: 2, kind: input, shape index: {}]   ;;  %s775_s3 = inlined_call_operand.vmem [shape: bf16[32,16], index: 3, kind: input, shape index: {}]   ;;  %s776_s0 = inlined_call_operand.vmem [shape: bf16[48,512], index: 0, kind: input, shape index: {}]   ;;  %s777_s1 = inlined_call_operand.vmem [shape: bf16[32,48], index: 1, kind: input, shape index: {}]   ;;  %s778_s4 = inlined_call_operand.vmem [shape: f32[8,512], index: 4, kind: input, shape index: {}]   ;;  %s779_s6 = inlined_call_operand.vmem [shape: f32[8,512], index: 6, kind: output, shape index: {1}]   ;;  %s780_s5 = inlined_call_operand.vmem [shape: f32[8,512], index: 5, kind: output, shape index: {0}]  }
   0x1   :  { %v546_v0 = vld [vmem:[%s774_s2 + $0x4] ss:$16 sps:$4 sm:$0xff]   ;;  %116 = vmatprep.mubr.bf16.mxu0 %v638_v1  ;;  %169 = vmatprep.mubr.bf16.mxu1 %v638_v1  ;;  %v548_v2 = vld [vmem:[%s774_s2 + $0xc] ss:$16 sps:$4 sm:$0xff]   ;;  %v550_v3 = vld [vmem:[%s774_s2] ss:$16 sps:$4 sm:$0xff]  }
   0x2   :  { %84 = vmatprep.subr.bf16.mxu0 %v546_v0  ;;  %v551_v4 = vld [vmem:[%s774_s2 + $0x8] ss:$16 sps:$4 sm:$0xff]   ;;  %137 = vmatprep.subr.bf16.mxu1 %v548_v2  ;;  %v552_v5 = vld [vmem:[%s775_s3] sm:$0xff]   ;;  %v558_v9 = vld [vmem:[%s776_s0 + $0xc] ss:$16 sps:$4 sm:$0xff]  }
   0x3   :  { %85 = vmatpush1.bf16.msra.mxu0 %v550_v3  ;;  %138 = vmatpush1.bf16.msra.mxu1 %v551_v4  ;;  %v553_v6 = vld [vmem:[%s776_s0] ss:$16 sps:$4 sm:$0xff]   ;;  %v555_v7 = vld [vmem:[%s776_s0 + $0x4] ss:$16 sps:$4 sm:$0xff]   ;;  %v556_v8 = vld [vmem:[%s776_s0 + $0x8] ss:$16 sps:$4 sm:$0xff]  }
   0x4   :  { %267 = vmatprep.subr.bf16.mxu0 %v555_v7  ;;  %v561_v10 = vld [vmem:[%s776_s0 + $0x24] ss:$16 sps:$4 sm:$0xff]   ;;  %320 = vmatprep.subr.bf16.mxu1 %v558_v9  ;;  %v559_v11 = vld [vmem:[%s776_s0 + $0x20] ss:$16 sps:$4 sm:$0xff]   ;;  %v564_v12 = vld [vmem:[%s776_s0 + $0x2c] ss:$16 sps:$4 sm:$0xff]  }
   0x5   :  { %v562_v13 = vld [vmem:[%s776_s0 + $0x28] ss:$16 sps:$4 sm:$0xff]   ;;  %v568_v15 = vld [vmem:[%s776_s0 + $0x44] ss:$16 sps:$4 sm:$0xff]   ;;  %v566_v16 = vld [vmem:[%s776_s0 + $0x40] ss:$16 sps:$4 sm:$0xff]  }
   0x6   :  { %495 = vmatmul.mubr.msk.bf16.vlgmr.msra.gmra.mrb[0].mxu0 %vm77_vm0, %v552_v5  ;;  %497 = vmatmul.mubr.msk.bf16.vlgmr.msra.gmra.mrb[0].mxu1 %vm77_vm0, %v552_v5  ;;  %v565_v14 = vld [vmem:[%s775_s3 + $0x8] sm:$0xff]   ;;  %v572_v19 = vld [vmem:[%s777_s1] sm:$0xff]  }
   0x7   :  { %268 = vmatpush1.bf16.msra.mxu0 %v553_v6  ;;  %321 = vmatpush1.bf16.msra.mxu1 %v556_v8  ;;  %v571_v17 = vld [vmem:[%s776_s0 + $0x4c] ss:$16 sps:$4 sm:$0xff]   ;;  %v569_v18 = vld [vmem:[%s776_s0 + $0x48] ss:$16 sps:$4 sm:$0xff]  }
   0x8   :  { %269 = vmatprep.subr.bf16.mxu0 %v561_v10  ;;  %322 = vmatprep.subr.bf16.mxu1 %v564_v12  ;;  %v573_v20 = vld [vmem:[%s777_s1 + $0x8] sm:$0xff]   ;;  %v449_v10 = vld [vmem:[%s778_s4] sm:$0xff] }
   0x9   :  { %126 = vmatprep.mubr.bf16.mxu0 %v638_v1  ;;  %179 = vmatprep.mubr.bf16.mxu1 %v638_v1 }
   0xb   :  { %270 = vmatpush1.bf16.msra.mxu0 %v559_v11  ;;  %323 = vmatpush1.bf16.msra.mxu1 %v562_v13  ;;  %v451_v13 = vld [vmem:[%s778_s4 + $0x10] sm:$0xff] }
   0xc   :  { %271 = vmatprep.subr.bf16.mxu0 %v568_v15  ;;  %324 = vmatprep.subr.bf16.mxu1 %v571_v17 }
   0xe   :  { %496 = vmatmul.mubr.msk.bf16.gmra.mrb[4].mxu0 %vm77_vm0, %v565_v14  ;;  %498 = vmatmul.mubr.msk.bf16.gmra.mrb[4].mxu1 %vm77_vm0, %v565_v14 }
   0xf   :  { %272 = vmatpush1.bf16.msra.mxu0 %v566_v16  ;;  %299 = vmatprep.mubr.bf16.mxu0 %v638_v1  ;;  %v450_v16 = vld [vmem:[%s778_s4 + $0x8] sm:$0xff] }
  0x10   :  { %325 = vmatpush1.bf16.msra.mxu1 %v569_v18  ;;  %352 = vmatprep.mubr.bf16.mxu1 %v638_v1 }
  0x16   :  { %513 = vmatmul.mubr.msk.bf16.vlgmr.msra.gmra.mrb[0].mxu0 %vm260_vm1, %v572_v19  ;;  %515 = vmatmul.mubr.msk.bf16.vlgmr.msra.gmra.mrb[0].mxu1 %vm260_vm1, %v572_v19 }
  0x17   :  { %309 = vmatprep.mubr.bf16.mxu0 %v638_v1  ;;  %362 = vmatprep.mubr.bf16.mxu1 %v638_v1 }
  0x1e   :  { %514 = vmatmul.mubr.msk.bf16.gmra.mrb[4].mxu0 %vm260_vm1, %v573_v20  ;;  %516 = vmatmul.mubr.msk.bf16.gmra.mrb[4].mxu1 %vm260_vm1, %v573_v20 }
  0xe9   :  { %v301_v21 = vpop.f32.mrb[0].mxu0  ;;  %v354_v22 = vpop.f32.mrb[0].mxu1 }
  0xea   :  { %v517_v23 = vmul.f32 -1.442695, %v301_v21  ;;  %v519_v24 = vmul.f32 -1.442695, %v354_v22  ;;  %v303_v25 = vpop.f32.mrb[1].mxu0  ;;  %v356_v26 = vpop.f32.mrb[1].mxu1 }
  0xeb   :  { %v518_v27 = vmul.f32 -1.442695, %v303_v25  ;;  %v520_v28 = vmul.f32 -1.442695, %v356_v26  ;;  %v305_v29 = vpop.f32.mrb[2].mxu0  ;;  %v358_v30 = vpop.f32.mrb[2].mxu1 }
  0xec   :  { %574 = vpow2.f32 %v517_v23  ;;  %v521_v31 = vmul.f32 -1.442695, %v305_v29  ;;  %v307_v32 = vpop.f32.mrb[3].mxu0  ;;  %v360_v33 = vpop.f32.mrb[3].mxu1  ;;  %v523_v34 = vmul.f32 -1.442695, %v358_v30 }
  0xed   :  { %576 = vpow2.f32 %v519_v24  ;;  %v522_v35 = vmul.f32 -1.442695, %v307_v32  ;;  %v524_v36 = vmul.f32 -1.442695, %v360_v33  ;;  %v452_v21 = vld [vmem:[%s778_s4 + $0x18] sm:$0xff] }
  0xee   :  { %578 = vpow2.f32 %v518_v27 }
  0xef   :  { %580 = vpow2.f32 %v520_v28 }
  0xf0   :  { %582 = vpow2.f32 %v521_v31 }
  0xf1   :  { %584 = vpow2.f32 %v523_v34  ;;  %v311_v37 = vpop.f32.mrb[4].mxu0  ;;  %v364_v38 = vpop.f32.mrb[4].mxu1 }
  0xf2   :  { %586 = vpow2.f32 %v522_v35  ;;  %v313_v39 = vpop.f32.mrb[5].mxu0  ;;  %v366_v40 = vpop.f32.mrb[5].mxu1 }
  0xf3   :  { %588 = vpow2.f32 %v524_v36  ;;  %v315_v41 = vpop.f32.mrb[6].mxu0  ;;  %v368_v42 = vpop.f32.mrb[6].mxu1 }
  0xf4   :  { %590 = vtanh.f32 %v311_v37  ;;  %v525_v43 = vmul.f32 -1.442695, %v315_v41  ;;  %v317_v44 = vpop.f32.mrb[7].mxu0  ;;  %v370_v45 = vpop.f32.mrb[7].mxu1  ;;  %v527_v61 = vmul.f32 -1.442695, %v368_v42 }
  0xf5   :  { %592 = vtanh.f32 %v364_v38  ;;  %v526_v0 = vmul.f32 -1.442695, %v317_v44  ;;  %v528_v2 = vmul.f32 -1.442695, %v370_v45 }
  0xf6   :  { %v575_v46 = vpop.eup %574  ;;  %594 = vtanh.f32 %v313_v39 }
  0xf7   :  { %v577_v47 = vpop.eup %576  ;;  %v385_v48 = vadd.f32 1.0, %v575_v46  ;;  %596 = vtanh.f32 %v366_v40 }
  0xf8   :  { %v579_v49 = vpop.eup %578  ;;  %v387_v50 = vadd.f32 1.0, %v577_v47  ;;  %598 = vpow2.f32 %v525_v43 }
  0xf9   :  { %v581_v51 = vpop.eup %580  ;;  %600 = vrcp.f32 %v385_v48  ;;  %v386_v52 = vadd.f32 1.0, %v579_v49 }
  0xfa   :  { %v583_v53 = vpop.eup %582  ;;  %602 = vrcp.f32 %v387_v50  ;;  %v388_v54 = vadd.f32 1.0, %v581_v51 }
  0xfb   :  { %v585_v55 = vpop.eup %584  ;;  %604 = vrcp.f32 %v386_v52  ;;  %v409_v56 = vadd.f32 1.0, %v583_v53 }
  0xfc   :  { %v587_v57 = vpop.eup %586  ;;  %606 = vrcp.f32 %v388_v54  ;;  %v411_v58 = vadd.f32 1.0, %v585_v55 }
  0xfd   :  { %v589_v59 = vpop.eup %588  ;;  %608 = vrcp.f32 %v409_v56  ;;  %v410_v60 = vadd.f32 1.0, %v587_v57 }
  0xfe   :  { %v591_v62 = vpop.eup %590  ;;  %610 = vrcp.f32 %v411_v58  ;;  %v412_v63 = vadd.f32 1.0, %v589_v59 }
  0xff   :  { %v593_v1 = vpop.eup %592  ;;  %612 = vrcp.f32 %v410_v60 }
 0x100   :  { %v595_v3 = vpop.eup %594  ;;  %614 = vrcp.f32 %v412_v63 }
 0x101   :  { %v597_v4 = vpop.eup %596  ;;  %616 = vpow2.f32 %v527_v61 }
 0x102   :  { %v599_v5 = vpop.eup %598  ;;  %618 = vpow2.f32 %v526_v0 }
 0x103   :  { %v601_v6 = vpop.eup %600  ;;  %620 = vpow2.f32 %v528_v2  ;;  %v437_v18 = vadd.f32 1.0, %v599_v5 }
 0x104   :  { %v603_v7 = vpop.eup %602  ;;  %v457_v8 = vmul.f32 %v601_v6, %v591_v62 }
 0x105   :  { %v605_v9 = vpop.eup %604  ;;  %v459_v11 = vmul.f32 %v603_v7, %v593_v1  ;;  %622 = vrcp.f32 %v437_v18 }
 0x106   :  { %v607_v12 = vpop.eup %606  ;;  %v458_v14 = vmul.f32 %v605_v9, %v595_v3 }
 0x107   :  { %v609_v15 = vpop.eup %608  ;;  %v460_v17 = vmul.f32 %v607_v12, %v597_v4 }
 0x108   :  { %v611_v19 = vpop.eup %610  ;;  %v453_v20 = vmul.f32 %v609_v15, %v449_v10 }
 0x109   :  { %v613_v22 = vpop.eup %612  ;;  %v455_v23 = vmul.f32 %v611_v19, %v451_v13 }
 0x10a   :  { %v615_v24 = vpop.eup %614  ;;  %v454_v25 = vmul.f32 %v613_v22, %v450_v16  ;;  %v461_v26 = vadd.f32 %v457_v8, %v453_v20 }
 0x10b   :  { %v617_v27 = vpop.eup %616  ;;  %v456_v28 = vmul.f32 %v615_v24, %v452_v21  ;;  %v463_v29 = vadd.f32 %v459_v11, %v455_v23 }
 0x10c   :  { %v619_v30 = vpop.eup %618  ;;  %624 = vtanh.f32 %v461_v26  ;;  %477 = vst [vmem:[%s779_s6] sm:$0xff] %v461_v26  ;;  %v462_v31 = vadd.f32 %v458_v14, %v454_v25  ;;  %v439_v32 = vadd.f32 1.0, %v617_v27 }
 0x10d   :  { %v621_v33 = vpop.eup %620  ;;  %626 = vtanh.f32 %v463_v29  ;;  %479 = vst [vmem:[%s779_s6 + $0x10] sm:$0xff] %v463_v29  ;;  %v464_v34 = vadd.f32 %v460_v17, %v456_v28  ;;  %v438_v35 = vadd.f32 1.0, %v619_v30 }
 0x10e   :  { %628 = vtanh.f32 %v462_v31  ;;  %478 = vst [vmem:[%s779_s6 + $0x8] sm:$0xff] %v462_v31  ;;  %v440_v36 = vadd.f32 1.0, %v621_v33 }
 0x10f   :  { %630 = vtanh.f32 %v464_v34  ;;  %480 = vst [vmem:[%s779_s6 + $0x18] sm:$0xff] %v464_v34  ;;  %v623_v37 = vpop.eup %622 }
 0x110   :  { %632 = vrcp.f32 %v439_v32 }
 0x111   :  { %634 = vrcp.f32 %v438_v35 }
 0x112   :  { %636 = vrcp.f32 %v440_v36 }
 0x116   :  { %v625_v38 = vpop.eup %624 }
 0x117   :  { %v627_v39 = vpop.eup %626  ;;  %v469_v40 = vmul.f32 %v625_v38, %v623_v37 }
 0x118   :  { %v629_v41 = vpop.eup %628 }
 0x119   :  { %v631_v42 = vpop.eup %630  ;;  %473 = vst [vmem:[%s780_s5] sm:$0xff] %v469_v40 }
 0x11a   :  { %v633_v43 = vpop.eup %632 }
 0x11b   :  { %v635_v44 = vpop.eup %634  ;;  %v471_v45 = vmul.f32 %v633_v43, %v627_v39 }
 0x11c   :  { %v637_v46 = vpop.eup %636  ;;  %v470_v47 = vmul.f32 %v635_v44, %v629_v41 }
 0x11d   :  { %475 = vst [vmem:[%s780_s5 + $0x10] sm:$0xff] %v471_v45  ;;  %v472_v48 = vmul.f32 %v637_v46, %v631_v42 }
 0x11e   :  { %474 = vst [vmem:[%s780_s5 + $0x8] sm:$0xff] %v470_v47 }
 0x11f   :  { %476 = vst [vmem:[%s780_s5 + $0x18] sm:$0xff] %v472_v48 }

</bundles_post_ra>
